<compile_context>
chip_gen: v7x
topology: tpu7x:2x2x1
jax: 0.10.0
libtpu: 0.0.40
codegen_flags: <defaults>
</compile_context>

<pallas_src>
import jax
import jax.numpy as jnp
from jax import lax
from jax.experimental import pallas as pl
from jax.experimental.pallas import tpu as pltpu


def _round_up(x, m):
    return ((x + m - 1) // m) * m


def embedding_bag_fc_kernel(text_ref, bag_ref, invlen_ref, ew_ref, b_ref,
                            out_ref, gathered_ref):
    """Fused EmbeddingBag(mean) + Linear over one bag tile.

    text_ref    : (T_pad, 1)        int32 VMEM  token ids (pad rows = 0)
    bag_ref     : (1, T_pad)        int32 VMEM  bag id per token (pad = -1)
    invlen_ref  : (BAG_TILE, 1)     f32   VMEM  1 / max(len, 1) per bag
    ew_ref      : (V_pad, O_pad)    f32   VMEM  fused emb @ fc_w.T
    b_ref       : (1, O_pad)        f32   VMEM  fc bias
    out_ref     : (BAG_TILE, O_pad) f32   VMEM  output tile
    gathered_ref: (T_pad, O_pad)    f32   VMEM scratch, persistent across tiles
    """
    tile = pl.program_id(0)
    bag_tile = out_ref.shape[0]
    t_pad = text_ref.shape[0]
    v_pad = ew_ref.shape[0]

    # --- hoisted, tile-invariant work: gathered[t, :] = EW[text[t], :] -------
    # Built once (first grid step) via a one-hot MXU matmul; the scratch
    # persists across the sequential grid, so later tiles only read it.
    @pl.when(tile == 0)
    def _():
        tok = text_ref[...]                                        # (T_pad, 1)
        v_iota = lax.broadcasted_iota(jnp.int32, (t_pad, v_pad), 1)
        one_hot = (tok == v_iota).astype(jnp.float32)              # (T_pad, V_pad)
        gathered_ref[...] = jnp.dot(one_hot, ew_ref[...],
                                    preferred_element_type=jnp.float32)

    # --- per-tile work: one MXU matmul ---------------------------------------
    # seg[b, t] = (bag_id[t] == global_bag_index b); pad tokens (bag_id = -1)
    # never match, so they contribute nothing.
    bid = bag_ref[...]                                             # (1, T_pad)
    b_iota = (lax.broadcasted_iota(jnp.int32, (bag_tile, t_pad), 0)
              + tile * bag_tile)
    seg = (bid == b_iota).astype(jnp.float32)                      # (BAG_TILE, T_pad)

    acc = jnp.dot(seg, gathered_ref[...],
                  preferred_element_type=jnp.float32)              # (BAG_TILE, O_pad)

    # mean (precomputed reciprocal lengths, exact) + bias; lane-dense store.
    out_ref[...] = acc * invlen_ref[...] + b_ref[...]


def prepare_params(emb_table, fc_w, fc_b):
    """One-time parameter prep (hoisted out of the forward path).

    Returns the fused, padded EW = emb @ fc_w.T, padded bias, and out_dim.
    """
    V, _D = emb_table.shape
    O = fc_w.shape[0]
    v_pad = max(_round_up(V, 128), 128)     # lane-dense / MXU-aligned K
    o_pad = max(_round_up(O, 128), 128)     # lane-dense output store

    ew = jnp.dot(emb_table.astype(jnp.float32), fc_w.T.astype(jnp.float32),
                 precision=lax.Precision.HIGHEST)                  # (V, O)
    ew_p = jnp.zeros((v_pad, o_pad), jnp.float32).at[:V, :O].set(ew)
    b_p = jnp.zeros((1, o_pad), jnp.float32).at[0, :O].set(
        fc_b.astype(jnp.float32))
    return ew_p, b_p, O


def text_category_forward(text, offsets, ew_p, b_p, out_dim, *, bag_tile=128):
    """text: (T,) int, offsets: (B,) int (non-decreasing, offsets[0]==0).
    ew_p/b_p from prepare_params().  Returns (B, out_dim) float32."""
    T = int(text.shape[0])
    B = int(offsets.shape[0])
    v_pad, o_pad = ew_p.shape

    # Big MXU-filling bag tiles, but don't over-pad tiny batches.
    bag_tile = min(bag_tile, max(_round_up(B, 8), 8))
    b_pad = _round_up(B, bag_tile)
    t_pad = max(_round_up(T, 128), 128)

    offs = offsets.astype(jnp.int32)

    # bag id per token (pad tokens get -1 so they match no bag row).
    t_idx = jnp.arange(T, dtype=jnp.int32)
    bag_ids = (jnp.searchsorted(offs, t_idx, side='right') - 1).astype(jnp.int32)

    # Exact per-bag reciprocal lengths from offsets (empty bag -> 1, seg row
    # is zero anyway so output = bias, matching torch).
    lengths = jnp.diff(jnp.concatenate([offs, jnp.array([T], jnp.int32)]))
    inv_len = (1.0 / jnp.maximum(lengths, 1)).astype(jnp.float32)  # (B,)

    text_col = jnp.zeros((t_pad, 1), jnp.int32).at[:T, 0].set(
        text.astype(jnp.int32))
    bag_row = jnp.full((1, t_pad), -1, jnp.int32).at[0, :T].set(bag_ids)
    invlen_col = jnp.zeros((b_pad, 1), jnp.float32).at[:B, 0].set(inv_len)

    grid = (b_pad // bag_tile,)

    out_padded = pl.pallas_call(
        embedding_bag_fc_kernel,
        out_shape=jax.ShapeDtypeStruct((b_pad, o_pad), jnp.float32),
        grid_spec=pltpu.PrefetchScalarGridSpec(
            num_scalar_prefetch=0,
            grid=grid,
            in_specs=[
                pl.BlockSpec((t_pad, 1), lambda i: (0, 0)),        # token ids
                pl.BlockSpec((1, t_pad), lambda i: (0, 0)),        # bag ids
                pl.BlockSpec((bag_tile, 1), lambda i: (i, 0)),     # 1/len per bag
                pl.BlockSpec((v_pad, o_pad), lambda i: (0, 0)),    # fused EW
                pl.BlockSpec((1, o_pad), lambda i: (0, 0)),        # fc bias
            ],
            out_specs=pl.BlockSpec((bag_tile, o_pad), lambda i: (i, 0)),
            scratch_shapes=[pltpu.VMEM((t_pad, o_pad), jnp.float32)],
        ),
        compiler_params=pltpu.CompilerParams(
            # "arbitrary": the hoisted `gathered` scratch must be built before
            # any later tile reads it (sequential grid on one TC).
            dimension_semantics=("arbitrary",),
            vmem_limit_bytes=32 * 1024 * 1024,   # raise v5e's 16 MiB default
        ),
    )(text_col, bag_row, invlen_col, ew_p, b_p)

    return out_padded[:B, :out_dim]


def reference_forward(text, offsets, emb_table, fc_w, fc_b):
    """Plain-JAX reference of EmbeddingBag(mean) + Linear."""
    T = text.shape[0]
    offsets_ext = jnp.concatenate(
        [offsets, jnp.array([T], dtype=offsets.dtype)])
    outs = []
    for i in range(offsets.shape[0]):
        s, e = int(offsets_ext[i]), int(offsets_ext[i + 1])
        rows = emb_table[text[s:e]]
        mean = rows.mean(axis=0) if e > s else jnp.zeros(emb_table.shape[1])
        outs.append(mean)
    embedded = jnp.stack(outs)
    return jnp.dot(embedded, fc_w.T, precision=lax.Precision.HIGHEST) + fc_b


if __name__ == "__main__":
    # params: vocabSize=64, embeddingDim=32, outputDim=8
    VOCAB, EMB_DIM, OUT_DIM = 64, 32, 8
    NUM_BAGS, TOTAL_TOKENS = 2, 10

    key = jax.random.PRNGKey(0)
    k_emb, k_fcw, k_text = jax.random.split(key, 3)

    initrange = 0.5
    # init_weights(): embedding & fc weight ~ U(-0.5, 0.5), fc bias = 0
    emb_table = jax.random.uniform(k_emb, (VOCAB, EMB_DIM), jnp.float32,
                                   minval=-initrange, maxval=initrange)
    fc_w = jax.random.uniform(k_fcw, (OUT_DIM, EMB_DIM), jnp.float32,
                              minval=-initrange, maxval=initrange)
    fc_b = jnp.zeros((OUT_DIM,), jnp.float32)

    # forward inputs: flat token stream + per-bag offsets
    text = jax.random.randint(k_text, (TOTAL_TOKENS,), 0, VOCAB, jnp.int32)
    offsets = jnp.array([0, 6], dtype=jnp.int32)   # bag0: tokens 0..5, bag1: 6..9

    # One-time parameter prep (fused EW, padding) — reused across forwards.
    ew_p, b_p, out_dim = prepare_params(emb_table, fc_w, fc_b)

    out = text_category_forward(text, offsets, ew_p, b_p, out_dim)
    out = jax.block_until_ready(out)

    ref = reference_forward(text, offsets, emb_table, fc_w, fc_b)
    assert out.shape == (NUM_BAGS, OUT_DIM)
    assert jnp.allclose(out, ref, atol=1e-4, rtol=1e-4), (out, ref)

    print("KERNEL_OK")
</pallas_src>

<mosaic_0001>
module attributes {stable_mosaic.version = 11 : i64} {
  func.func @embedding_bag_fc_kernel(%arg0: i32, %arg1: memref<128x1xi32, #tpu.memory_space<vmem>>, %arg2: memref<1x128xi32, #tpu.memory_space<vmem>>, %arg3: memref<8x1xf32, #tpu.memory_space<vmem>>, %arg4: memref<128x128xf32, #tpu.memory_space<vmem>>, %arg5: memref<1x128xf32, #tpu.memory_space<vmem>>, %arg6: memref<8x128xf32, #tpu.memory_space<vmem>>, %arg7: memref<128x128xf32, #tpu.memory_space<vmem>>) attributes {dimension_semantics = [#tpu.dimension_semantics<arbitrary>], iteration_bounds = array<i64: 1>, scalar_prefetch = 0 : i64, scratch_operands = 1 : i64, tpu.core_type = #tpu.core_type<tc>, window_params = [{pipeline_mode = #tpu.pipeline_mode<synchronous>, transform_indices = @transform_0, window_bounds = array<i64: 128, 1>}, {pipeline_mode = #tpu.pipeline_mode<synchronous>, transform_indices = @transform_1, window_bounds = array<i64: 1, 128>}, {transform_indices = @transform_2, window_bounds = array<i64: 8, 1>}, {pipeline_mode = #tpu.pipeline_mode<synchronous>, transform_indices = @transform_3, window_bounds = array<i64: 128, 128>}, {pipeline_mode = #tpu.pipeline_mode<synchronous>, transform_indices = @transform_4, window_bounds = array<i64: 1, 128>}, {transform_indices = @transform_5, window_bounds = array<i64: 8, 128>}]} {
    %c0_i32 = arith.constant 0 : i32
    %0 = arith.cmpi eq, %arg0, %c0_i32 : i32
    %1 = arith.extui %0 : i1 to i32
    %c0_i32_0 = arith.constant 0 : i32
    %2 = arith.cmpi ne, %1, %c0_i32_0 : i32
    scf.if %2 {
      %c0_10 = arith.constant 0 : index
      %c0_11 = arith.constant 0 : index
      %21 = vector.load %arg1[%c0_10, %c0_11] : memref<128x1xi32, #tpu.memory_space<vmem>>, vector<128x1xi32>
      %22 = tpu.iota {dimensions = array<i32: 1>} : vector<128x128xi32>
      %23 = vector.broadcast %21 : vector<128x1xi32> to vector<128x128xi32>
      %24 = arith.cmpi eq, %23, %22 : vector<128x128xi32>
      %25 = arith.extui %24 : vector<128x128xi1> to vector<128x128xi32>
      %26 = arith.sitofp %25 : vector<128x128xi32> to vector<128x128xf32>
      %c0_12 = arith.constant 0 : index
      %c0_13 = arith.constant 0 : index
      %27 = vector.load %arg4[%c0_12, %c0_13] : memref<128x128xf32, #tpu.memory_space<vmem>>, vector<128x128xf32>
      %cst_14 = arith.constant dense<0.000000e+00> : vector<128x128xf32>
      %28 = tpu.matmul %26, %27, %cst_14 {dimension_numbers = #tpu.dot_dimension_numbers<[1], [0], [0], [1], [0, 0, 1, 1], [], []>} : vector<128x128xf32>, vector<128x128xf32>, vector<128x128xf32> -> vector<128x128xf32>
      %c0_15 = arith.constant 0 : index
      %c0_16 = arith.constant 0 : index
      %29 = vector.load %arg7[%c0_15, %c0_16] : memref<128x128xf32, #tpu.memory_space<vmem>>, vector<128x128xf32>
      tpu.vector_store %arg7[%c0_15, %c0_16], %28 {strides = array<i32>} : memref<128x128xf32, #tpu.memory_space<vmem>>, vector<128x128xf32>,
    } else {
    }
    %c0 = arith.constant 0 : index
    %c0_1 = arith.constant 0 : index
    %3 = vector.load %arg2[%c0, %c0_1] : memref<1x128xi32, #tpu.memory_space<vmem>>, vector<1x128xi32>
    %4 = tpu.iota {dimensions = array<i32: 0>} : vector<8x128xi32>
    %c8_i32 = arith.constant 8 : i32
    %5 = arith.muli %arg0, %c8_i32 : i32
    %6 = vector.broadcast %5 : i32 to vector<8x128xi32>
    %7 = arith.addi %4, %6 : vector<8x128xi32>
    %8 = vector.broadcast %3 : vector<1x128xi32> to vector<8x128xi32>
    %9 = arith.cmpi eq, %8, %7 : vector<8x128xi32>
    %10 = arith.extui %9 : vector<8x128xi1> to vector<8x128xi32>
    %11 = arith.sitofp %10 : vector<8x128xi32> to vector<8x128xf32>
    %c0_2 = arith.constant 0 : index
    %c0_3 = arith.constant 0 : index
    %12 = vector.load %arg7[%c0_2, %c0_3] : memref<128x128xf32, #tpu.memory_space<vmem>>, vector<128x128xf32>
    %cst = arith.constant dense<0.000000e+00> : vector<8x128xf32>
    %13 = tpu.matmul %11, %12, %cst {dimension_numbers = #tpu.dot_dimension_numbers<[1], [0], [0], [1], [0, 0, 1, 1], [], []>} : vector<8x128xf32>, vector<128x128xf32>, vector<8x128xf32> -> vector<8x128xf32>
    %c0_4 = arith.constant 0 : index
    %c0_5 = arith.constant 0 : index
    %14 = vector.load %arg3[%c0_4, %c0_5] : memref<8x1xf32, #tpu.memory_space<vmem>>, vector<8x1xf32>
    %15 = vector.broadcast %14 : vector<8x1xf32> to vector<8x128xf32>
    %16 = arith.mulf %13, %15 : vector<8x128xf32>
    %c0_6 = arith.constant 0 : index
    %c0_7 = arith.constant 0 : index
    %17 = vector.load %arg5[%c0_6, %c0_7] : memref<1x128xf32, #tpu.memory_space<vmem>>, vector<1x128xf32>
    %18 = vector.broadcast %17 : vector<1x128xf32> to vector<8x128xf32>
    %19 = arith.addf %16, %18 : vector<8x128xf32>
    %c0_8 = arith.constant 0 : index
    %c0_9 = arith.constant 0 : index
    %20 = vector.load %arg6[%c0_8, %c0_9] : memref<8x128xf32, #tpu.memory_space<vmem>>, vector<8x128xf32>
    tpu.vector_store %arg6[%c0_8, %c0_9], %19 {strides = array<i32>} : memref<8x128xf32, #tpu.memory_space<vmem>>, vector<8x128xf32>,
    return
  }
  func.func @transform_0(%arg0: i32) -> (i32, i32) {
    %c0_i32 = arith.constant 0 : i32
    %c0_i32_0 = arith.constant 0 : i32
    %c0_i32_1 = arith.constant 0 : i32
    return %c0_i32, %c0_i32_0 : i32, i32
  }
  func.func @transform_1(%arg0: i32) -> (i32, i32) {
    %c0_i32 = arith.constant 0 : i32
    %c0_i32_0 = arith.constant 0 : i32
    %c0_i32_1 = arith.constant 0 : i32
    return %c0_i32, %c0_i32_0 : i32, i32
  }
  func.func @transform_2(%arg0: i32) -> (i32, i32) {
    %c0_i32 = arith.constant 0 : i32
    %c0_i32_0 = arith.constant 0 : i32
    return %arg0, %c0_i32 : i32, i32
  }
  func.func @transform_3(%arg0: i32) -> (i32, i32) {
    %c0_i32 = arith.constant 0 : i32
    %c0_i32_0 = arith.constant 0 : i32
    %c0_i32_1 = arith.constant 0 : i32
    return %c0_i32, %c0_i32_0 : i32, i32
  }
  func.func @transform_4(%arg0: i32) -> (i32, i32) {
    %c0_i32 = arith.constant 0 : i32
    %c0_i32_0 = arith.constant 0 : i32
    %c0_i32_1 = arith.constant 0 : i32
    return %c0_i32, %c0_i32_0 : i32, i32
  }
  func.func @transform_5(%arg0: i32) -> (i32, i32) {
    %c0_i32 = arith.constant 0 : i32
    %c0_i32_0 = arith.constant 0 : i32
    return %arg0, %c0_i32 : i32, i32
  }
}

</mosaic_0001>

<bundles_post_ra>
// kernel: tpu_custom_call.1
= control target key start
LH: loop header
LB: loop body
LE: loop exit
PB: predicated region body
PF: predicated region fallthrough
CT: control target
= control target key end

     0   :  { %v709_v2 = vmov 0   ;;  %s881_s0 = inlined_call_operand.vmem [shape: s32[128,1], index: 0, kind: input, shape index: {}]   ;;  %s882_s1 = inlined_call_operand.vmem [shape: s32[1,128], index: 1, kind: input, shape index: {}]   ;;  %s883_s2 = inlined_call_operand.vmem [shape: f32[8,1], index: 2, kind: input, shape index: {}]   ;;  %s884_s3 = inlined_call_operand.vmem [shape: f32[128,128], index: 3, kind: input, shape index: {}]   ;;  %s885_s4 = inlined_call_operand.vmem [shape: f32[1,128], index: 4, kind: input, shape index: {}]   ;;  %s886_s5 = inlined_call_operand.hbm [shape: f32[8,128], index: 5, kind: output, shape index: {}]  }
   0x1   :  { %v27_v0 = vld [vmem:[%s881_s0 + $0x10] sm:$0xff]  ;;  %v25_v1 = vld [vmem:[%s881_s0] sm:$0xff]  ;;  %684 = vset.pattern.permute.xlu1 %v709_v2  ;;  %683 = vset.pattern.permute.xlu0 %v709_v2  ;;  %v28_v3 = vld [vmem:[%s881_s0 + $0x18] sm:$0xff] }
   0x2   :  { %50 = vperm.xlu1 %684, %v27_v0   ;;  %44 = vperm.xlu0 %683, %v25_v1   ;;  %v26_v4 = vld [vmem:[%s881_s0 + $0x8] sm:$0xff]  ;;  %v139_v5 = vld [vmem:[%s884_s3] sm:$0xff]  ;;  %v141_v7 = vld [vmem:[%s884_s3 + $0x10] sm:$0xff] }
   0x3   :  { %v140_v6 = vld [vmem:[%s884_s3 + $0x8] sm:$0xff]  ;;  %v142_v8 = vld [vmem:[%s884_s3 + $0x18] sm:$0xff]  ;;  %v29_v10 = vld [vmem:[%s881_s0 + $0x20] sm:$0xff] }
   0x4   :  { %v30_v9 = vld [vmem:[%s881_s0 + $0x28] sm:$0xff]  ;;  %v621_v11 = vpack.c.bf16 %v140_v6, %v139_v5  ;;  %v625_v12 = vpack.c.bf16 %v142_v8, %v141_v7  ;;  %v143_v13 = vld [vmem:[%s884_s3 + $0x20] sm:$0xff]  ;;  %v32_v15 = vld [vmem:[%s881_s0 + $0x38] sm:$0xff] }
   0x5   :  { %v144_v14 = vld [vmem:[%s884_s3 + $0x28] sm:$0xff]  ;;  %v31_v16 = vld [vmem:[%s881_s0 + $0x30] sm:$0xff] }
   0x6   :  { %53 = vperm.xlu1 %684, %v28_v3   ;;  %47 = vperm.xlu0 %683, %v26_v4  }
   0x7   :  { %622 = vmatprep.subr.bf16.mxu0 %v621_v11 }
   0x8   :  { %624 = vmatpush3.bf16.msra.mxu0 %v621_v11 }
   0xa   :  { %59 = vperm.xlu1 %684, %v30_v9   ;;  %56 = vperm.xlu0 %683, %v29_v10  }
   0xb   :  { %10 = vsyncpa [#allocation4], 0  ;;  %626 = vmatprep.subr.bf16.mxu0 %v625_v12  ;;  %v629_v17 = vpack.c.bf16 %v144_v14, %v143_v13  ;;  %v145_v18 = vld [vmem:[%s884_s3 + $0x30] sm:$0xff]  ;;  %v146_v19 = vld [vmem:[%s884_s3 + $0x38] sm:$0xff]  ;;  %v41_v42 = vlaneseq  ;;  %v710_v46 = vmov 1.0   ;;  %v711_v61 = vmov 0.0|0.0  }
   0xc   :  { %v34_v20 = vld [vmem:[%s881_s0 + $0x48] sm:$0xff]  ;;  %v33_v21 = vld [vmem:[%s881_s0 + $0x40] sm:$0xff]  ;;  %628 = vmatpush3.bf16.msra.mxu0 %v625_v12  ;;  %v633_v22 = vpack.c.bf16 %v146_v19, %v145_v18  ;;  %v36_v25 = vld [vmem:[%s881_s0 + $0x58] sm:$0xff]  ;;  %653 = vmatprep.subr.bf16.mxu1 %v711_v61  ;;  %v713_v62 = vmov 0.0   ;;  %s714_s10 = smov [#allocation3]  }
   0xd   :  { %630 = vmatprep.subr.bf16.mxu0 %v629_v17  ;;  %v147_v23 = vld [vmem:[%s884_s3 + $0x40] sm:$0xff]  ;;  %v148_v24 = vld [vmem:[%s884_s3 + $0x48] sm:$0xff]  ;;  %v35_v26 = vld [vmem:[%s881_s0 + $0x50] sm:$0xff]  ;;  %v42_v43 = vand.u32 127, %v41_v42  ;;  %s437_s11 = sshll.u32 %s714_s10, 4  ;;  %s438_s11 = int_to_ptr.vmem [resolvable:$true] %s437_s11 }
   0xe   :  { %65 = vperm.xlu1 %684, %v32_v15   ;;  %62 = vperm.xlu0 %683, %v31_v16   ;;  %v637_v27 = vpack.c.bf16 %v148_v24, %v147_v23  ;;  %v149_v28 = vld [vmem:[%s884_s3 + $0x50] sm:$0xff]  ;;  %v150_v29 = vld [vmem:[%s884_s3 + $0x58] sm:$0xff]  ;;  %v38_v30 = vld [vmem:[%s881_s0 + $0x68] sm:$0xff]  ;;  %s685_s12 = scalar_lea.vmem %s438_s11, 128  ;;  %p690_p1 = scmp.lt.s32.totalorder %s438_s11, %s438_s11 }
   0xf   :  { %v37_v31 = vld [vmem:[%s881_s0 + $0x60] sm:$0xff]  ;;  %v641_v32 = vpack.c.bf16 %v150_v29, %v149_v28  ;;  %v152_v34 = vld [vmem:[%s884_s3 + $0x68] sm:$0xff]  ;;  %v40_v35 = vld [vmem:[%s881_s0 + $0x78] sm:$0xff]  ;;  %p686_p0 = scmp.ne.s32.totalorder %s438_s11, %s685_s12  ;;  %p691_p2 = scmp.lt.s32.totalorder %s685_s12, %s685_s12 }
  0x10   :  { %632 = vmatpush3.bf16.msra.mxu0 %v629_v17  ;;  %v151_v33 = vld [vmem:[%s884_s3 + $0x60] sm:$0xff]  ;;  %v39_v36 = vld [vmem:[%s881_s0 + $0x70] sm:$0xff]  ;;  %v154_v39 = vld [vmem:[%s884_s3 + $0x78] sm:$0xff] }
  0x11   :  { %634 = vmatprep.subr.bf16.mxu0 %v633_v22  ;;  %v645_v37 = vpack.c.bf16 %v152_v34, %v151_v33  ;;  %v153_v38 = vld [vmem:[%s884_s3 + $0x70] sm:$0xff]  ;;  %v415_v40 = vld [vmem:[%s883_s2] sm:$0xff]  ;;  %p692_p3 = por %p691_p2, %p690_p1 }
  0x12   :  { %71 = vperm.xlu1 %684, %v34_v20   ;;  %68 = vperm.xlu0 %683, %v33_v21   ;;  %v649_v41 = vpack.c.bf16 %v154_v39, %v153_v38  ;;  %v318_v21 = vshrl.u32 %v41_v42, 7  ;;  %v477_v23 = vld [vmem:[%s882_s1] ss:$0 sm:$0xff] }
  0x13   :  { %p693_p4 = pnand %p692_p3, %p686_p0 }
  0x14   :  { %636 = vmatpush3.bf16.msra.mxu0 %v633_v22 }
  0x15   :  { %638 = vmatprep.subr.bf16.mxu0 %v637_v27 }
  0x16   :  { %77 = vperm.xlu1 %684, %v36_v25   ;;  %74 = vperm.xlu0 %683, %v35_v26  }
  0x18   :  { %640 = vmatpush3.bf16.msra.mxu0 %v637_v27  ;;  %v480_v27 = vld [vmem:[%s885_s4] ss:$0 sm:$0xff] }
  0x19   :  { %642 = vmatprep.subr.bf16.mxu0 %v641_v32 }
  0x1a   :  { %83 = vperm.xlu1 %684, %v38_v30   ;;  %80 = vperm.xlu0 %683, %v37_v31  }
  0x1c   :  { %644 = vmatpush3.bf16.msra.mxu0 %v641_v32 }
  0x1d   :  { %646 = vmatprep.subr.bf16.mxu0 %v645_v37 }
  0x1e   :  { %89 = vperm.xlu1 %684, %v40_v35   ;;  %86 = vperm.xlu0 %683, %v39_v36  }
  0x20   :  { %648 = vmatpush3.bf16.msra.mxu0 %v645_v37 }
  0x21   :  { %650 = vmatprep.subr.bf16.mxu0 %v649_v41 }
  0x22   :  { %418 = vperm.xlu0 %683, %v415_v40  }
  0x24   :  { %652 = vmatpush3.bf16.msra.mxu0 %v649_v41 }
  0x81   :  { %v51_v44 = vpop.permute.xlu1 %50  ;;  %v45_v45 = vpop.permute.xlu0 %44 }
  0x82   :  { %vm91_vm0 = vcmp.eq.s32.totalorder %v45_v45, %v42_v43  ;;  %vm93_vm1 = vcmp.eq.s32.totalorder %v51_v44, %v42_v43 }
  0x83   :  { %562 = vmatprep.mubr.msk.f32.mxu0 %vm91_vm0, %v710_v46  ;;  %vm712_vm0 = vmmov 0  }
  0x84   :  { %618 = vmatprep.mubr.msk.f32.mxu1 %vm712_vm0, %v713_v62 }
  0x85   :  { %v54_v47 = vpop.permute.xlu1 %53  ;;  %v48_v48 = vpop.permute.xlu0 %47 }
  0x86   :  { %vm92_vm2 = vcmp.eq.s32.totalorder %v48_v48, %v42_v43  ;;  %vm94_vm3 = vcmp.eq.s32.totalorder %v54_v47, %v42_v43 }
  0x87   :  { %563 = vmatmul.mubr.msk.f32.vlgmr.msra.gmra.mrb[0].mxu0 %vm92_vm2, %v710_v46 }
  0x88   :  { %565 = vmatprep.mubr.msk.f32.mxu0 %vm93_vm1, %v710_v46  ;;  %vm326_vm1 = vcmp.eq.s32.totalorder %v477_v23, %v318_v21 }
  0x89   :  { %v60_v49 = vpop.permute.xlu1 %59  ;;  %v57_v50 = vpop.permute.xlu0 %56 }
  0x8a   :  { %vm95_vm4 = vcmp.eq.s32.totalorder %v57_v50, %v42_v43  ;;  %vm96_vm5 = vcmp.eq.s32.totalorder %v60_v49, %v42_v43 }
  0x8b   :  { %566 = vmatmul.mubr.msk.f32.gmra.mrb[2].mxu0 %vm94_vm3, %v710_v46 }
  0x8c   :  { %568 = vmatprep.mubr.msk.f32.mxu0 %vm95_vm4, %v710_v46 }
  0x8d   :  { %v66_v51 = vpop.permute.xlu1 %65  ;;  %v63_v52 = vpop.permute.xlu0 %62 }
  0x8e   :  { %vm97_vm6 = vcmp.eq.s32.totalorder %v63_v52, %v42_v43  ;;  %vm98_vm7 = vcmp.eq.s32.totalorder %v66_v51, %v42_v43 }
  0x8f   :  { %569 = vmatmul.mubr.msk.f32.gmra.mrb[4].mxu0 %vm96_vm5, %v710_v46 }
  0x90   :  { %571 = vmatprep.mubr.msk.f32.mxu0 %vm97_vm6, %v710_v46 }
  0x91   :  { %v72_v53 = vpop.permute.xlu1 %71  ;;  %v69_v54 = vpop.permute.xlu0 %68 }
  0x92   :  { %vm99_vm8 = vcmp.eq.s32.totalorder %v69_v54, %v42_v43  ;;  %vm100_vm9 = vcmp.eq.s32.totalorder %v72_v53, %v42_v43 }
  0x93   :  { %572 = vmatmul.mubr.msk.f32.gmra.mrb[6].mxu0 %vm98_vm7, %v710_v46 }
  0x94   :  { %574 = vmatprep.mubr.msk.f32.mxu0 %vm99_vm8, %v710_v46 }
  0x95   :  { %v78_v55 = vpop.permute.xlu1 %77  ;;  %v75_v56 = vpop.permute.xlu0 %74 }
  0x96   :  { %vm101_vm10 = vcmp.eq.s32.totalorder %v75_v56, %v42_v43  ;;  %vm102_vm11 = vcmp.eq.s32.totalorder %v78_v55, %v42_v43 }
  0x97   :  { %575 = vmatmul.mubr.msk.f32.gmra.mrb[8].mxu0 %vm100_vm9, %v710_v46 }
  0x98   :  { %577 = vmatprep.mubr.msk.f32.mxu0 %vm101_vm10, %v710_v46 }
  0x99   :  { %v84_v57 = vpop.permute.xlu1 %83  ;;  %v81_v58 = vpop.permute.xlu0 %80 }
  0x9a   :  { %vm103_vm12 = vcmp.eq.s32.totalorder %v81_v58, %v42_v43  ;;  %vm104_vm13 = vcmp.eq.s32.totalorder %v84_v57, %v42_v43 }
  0x9b   :  { %578 = vmatmul.mubr.msk.f32.gmra.mrb[10].mxu0 %vm102_vm11, %v710_v46 }
  0x9c   :  { %580 = vmatprep.mubr.msk.f32.mxu0 %vm103_vm12, %v710_v46 }
  0x9d   :  { %v87_v59 = vpop.permute.xlu0 %86  ;;  %v90_v60 = vpop.permute.xlu1 %89 }
  0x9e   :  { %vm105_vm14 = vcmp.eq.s32.totalorder %v87_v59, %v42_v43  ;;  %vm106_vm15 = vcmp.eq.s32.totalorder %v90_v60, %v42_v43 }
  0x9f   :  { %581 = vmatmul.mubr.msk.f32.gmra.mrb[12].mxu0 %vm104_vm13, %v710_v46 }
  0xa0   :  { %583 = vmatprep.mubr.msk.f32.mxu0 %vm105_vm14, %v710_v46 }
  0xa1   :  { %v419_v25 = vpop.permute.xlu0 %418 }
  0xa3   :  { %584 = vmatmul.mubr.msk.f32.gmra.mrb[14].mxu0 %vm106_vm15, %v710_v46 }
 0x15a   :  { %v564_v63 = vpop.f32.mrb[0].mxu0 }
 0x15b   :  { %v221_v0 = vpop.f32.mrb[1].mxu0 }
 0x15c   :  { %v654_v1 = vpack.c.bf16 %v564_v63, %v221_v0 }
 0x15e   :  { %v567_v2 = vpop.f32.mrb[2].mxu0  ;;  %655 = vmatpush3.bf16.msra.mxu1 %v654_v1 }
 0x15f   :  { %v231_v3 = vpop.f32.mrb[3].mxu0  ;;  %656 = vmatprep.subr.bf16.mxu1 %v711_v61 }
 0x160   :  { %v657_v4 = vpack.c.bf16 %v567_v2, %v231_v3 }
 0x162   :  { %v570_v5 = vpop.f32.mrb[4].mxu0  ;;  %658 = vmatpush3.bf16.msra.mxu1 %v657_v4 }
 0x163   :  { %v241_v6 = vpop.f32.mrb[5].mxu0  ;;  %659 = vmatprep.subr.bf16.mxu1 %v711_v61 }
 0x164   :  { %v660_v7 = vpack.c.bf16 %v570_v5, %v241_v6 }
 0x166   :  { %v573_v8 = vpop.f32.mrb[6].mxu0  ;;  %661 = vmatpush3.bf16.msra.mxu1 %v660_v7 }
 0x167   :  { %v251_v9 = vpop.f32.mrb[7].mxu0  ;;  %662 = vmatprep.subr.bf16.mxu1 %v711_v61 }
 0x168   :  { %v663_v10 = vpack.c.bf16 %v573_v8, %v251_v9 }
 0x16a   :  { %v576_v11 = vpop.f32.mrb[8].mxu0  ;;  %664 = vmatpush3.bf16.msra.mxu1 %v663_v10 }
 0x16b   :  { %v261_v12 = vpop.f32.mrb[9].mxu0  ;;  %665 = vmatprep.subr.bf16.mxu1 %v711_v61 }
 0x16c   :  { %v666_v13 = vpack.c.bf16 %v576_v11, %v261_v12 }
 0x16e   :  { %v579_v14 = vpop.f32.mrb[10].mxu0  ;;  %667 = vmatpush3.bf16.msra.mxu1 %v666_v13 }
 0x16f   :  { %v271_v15 = vpop.f32.mrb[11].mxu0  ;;  %668 = vmatprep.subr.bf16.mxu1 %v711_v61 }
 0x170   :  { %v669_v16 = vpack.c.bf16 %v579_v14, %v271_v15 }
 0x172   :  { %v582_v17 = vpop.f32.mrb[12].mxu0  ;;  %670 = vmatpush3.bf16.msra.mxu1 %v669_v16 }
 0x173   :  { %v281_v18 = vpop.f32.mrb[13].mxu0  ;;  %671 = vmatprep.subr.bf16.mxu1 %v711_v61 }
 0x174   :  { %v672_v19 = vpack.c.bf16 %v582_v17, %v281_v18 }
 0x176   :  { %v585_v20 = vpop.f32.mrb[14].mxu0  ;;  %673 = vmatpush3.bf16.msra.mxu1 %v672_v19 }
 0x177   :  { %v291_v22 = vpop.f32.mrb[15].mxu0  ;;  %674 = vmatprep.subr.bf16.mxu1 %v711_v61 }
 0x178   :  { %v675_v24 = vpack.c.bf16 %v585_v20, %v291_v22 }
 0x17a   :  { %676 = vmatpush3.bf16.msra.mxu1 %v675_v24 }
 0x17d   :  { %619 = vmatmul.mubr.msk.f32.vlgmr.msra.gmra.mrb[0].mxu1 %vm326_vm1, %v710_v46 }
 0x250   :  { %v411_v26 = vpop.f32.mrb[0].mxu1 }
 0x251   :  { %v421_v28 = vmul.f32 %v419_v25, %v411_v26  ;;  %v620_v29 = vpop.f32.mrb[1].mxu1 }
 0x253   :  { %v429_v30 = vadd.f32 %v480_v27, %v421_v28 }
 0x255   :  { %430 = vst [vmem:[#allocation3] sm:$0xff] %v429_v30 }
 0x256   :  { %696 = shalt.err (!%p693_p4)
}
 0x257   :  { %s697_s14 = scalar_lea.hbm %s886_s5, 128 }
 0x258   :  { %p698_p5 = scmp.ne.s32.totalorder %s886_s5, %s697_s14  ;;  %p701_p6 = scmp.lt.u32.totalorder %s697_s14, %s886_s5 }
 0x25a   :  { %p703_p7 = pnand %p701_p6, %p698_p5 }
 0x25c   :  { %706 = shalt.err (!%p703_p7)
}
 0x25d   :  { %440 = dma.vmem_to_hbm [thread:$0]  %s438_s11, 128, %s886_s5, [#allocation4]  }
 0x25e   :  { %707 = dma.done.wait [#allocation4], 128  }
 0x25f   :  { %708 = vsyncadd [#allocation4], 4294967168 }
 0x260   :  { %444 = vsyncpa [#allocation4], 1 }

</bundles_post_ra>
